<compile_context>
chip_gen: v7x
topology: tpu7x:2x2x1
jax: 0.10.0
libtpu: 0.0.40
codegen_flags: <defaults>
</compile_context>

<pallas_src>
import jax
import jax.numpy as jnp
from jax.experimental import pallas as pl
from jax.experimental.pallas import tpu as pltpu

EV_A3_TO_GPA = 160.21766208
LANE = 128


# --------------------------------------------------------------------------
# Pallas kernel: per-graph stress = scale[g] * (bond_vec_g.T @ f_ij_g)
#                with scale[g] = -160.21766208 / volume[g]
# --------------------------------------------------------------------------
def _stress_kernel(scale_ref, bv_ref, fij_ref, out_ref):
    bv = bv_ref[...]        # (B_g, 3, E_pad)   lanes = edges
    fij = fij_ref[...]      # (B_g, 3, E_pad)
    # column f of the per-graph 3x3 virial: s[g, d, f] = sum_e bv[g,d,e]*fij[g,f,e]
    cols = [
        jnp.sum(bv * fij[:, f:f + 1, :], axis=-1, keepdims=True)   # (B_g, 3, 1)
        for f in range(3)
    ]
    s = jnp.concatenate(cols, axis=-1)                             # (B_g, 3, 3)
    out_ref[...] = s * scale_ref[...]                              # scale: (B_g, 1, 1)


def compute_stresses(bv_packed, fij_packed, scale, block_graphs):
    G_pad, _, E_pad = bv_packed.shape
    assert G_pad % block_graphs == 0
    grid = (G_pad // block_graphs,)
    return pl.pallas_call(
        _stress_kernel,
        out_shape=jax.ShapeDtypeStruct((G_pad, 3, 3), jnp.float32),
        grid=grid,
        in_specs=[
            pl.BlockSpec((block_graphs, 1, 1), lambda g: (g, 0, 0)),      # scale
            pl.BlockSpec((block_graphs, 3, E_pad), lambda g: (g, 0, 0)),  # bond_vec
            pl.BlockSpec((block_graphs, 3, E_pad), lambda g: (g, 0, 0)),  # f_ij
        ],
        out_specs=pl.BlockSpec((block_graphs, 3, 3), lambda g: (g, 0, 0)),
        compiler_params=pltpu.CompilerParams(
            dimension_semantics=("parallel",),   # graphs independent -> both TCs on v7x
        ),
    )(scale, bv_packed, fij_packed)


def _pack_edges(values, edge_graph_ids, within_idx, G_pad, E_pad):
    # Scatter (E, 3) edge features into a lane-dense (G_pad, 3, E_pad) slab.
    # Edges are assumed contiguous per graph (DGL batched-graph convention).
    return jnp.zeros((G_pad, 3, E_pad), jnp.float32).at[
        edge_graph_ids, :, within_idx].set(values.astype(jnp.float32))


# --------------------------------------------------------------------------
# Surrogate "M3GNet" energy model (plain JAX; differentiable).
# TODO(synk): the real M3GNet graph-convolution stack is a user-supplied
#             nn.Module black box; a differentiable surrogate is used here.
# --------------------------------------------------------------------------
def model_energy(pos, bond_vec, z, node_graph_ids, edge_graph_ids, params, G):
    r2 = jnp.sum(bond_vec * bond_vec, axis=-1, keepdims=True)          # (E, 1)
    feats = jnp.concatenate([r2, jnp.exp(-r2), jnp.cos(r2)], axis=-1)  # (E, 3)
    h = jnp.tanh(feats @ params["w1"] + params["b1"])                  # (E, H)
    e_edge = (h @ params["w2"])[:, 0]                                  # (E,)
    e_node = 0.01 * jnp.sum(pos * pos, axis=-1) * params["species_w"][z]  # (N,)
    e_graph_edges = jax.ops.segment_sum(e_edge, edge_graph_ids, num_segments=G)
    e_graph_nodes = jax.ops.segment_sum(e_node, node_graph_ids, num_segments=G)
    return e_graph_edges + e_graph_nodes                               # (G,)


# --------------------------------------------------------------------------
# Potential.forward
# --------------------------------------------------------------------------
def potential_forward(model_params, element_refs, pos, bond_vec, z,
                      node_graph_ids, edge_graph_ids, vol_per_graph, G,
                      calc_forces=True, calc_stresses=True, calc_hessian=False):
    forces = jnp.zeros((1,), jnp.float32)
    stresses = jnp.zeros((1,), jnp.float32)
    hessian = jnp.zeros((1,), jnp.float32)

    def energy_fn(p, bv):
        return model_energy(p, bv, z, node_graph_ids, edge_graph_ids,
                            model_params, G)

    total_energies = energy_fn(pos, bond_vec)                          # (G,)

    if element_refs is not None:
        # AtomRef offset in plain XLA: composition via scatter-add (no one_hot),
        # then a tiny (G, n_elem) @ (n_elem,) — not worth a pallas_call launch.
        n_elem = element_refs.shape[0]
        comp = jnp.zeros((G, n_elem), jnp.float32).at[node_graph_ids, z].add(1.0)
        total_energies = total_energies + comp @ element_refs.astype(jnp.float32)

    grads = None
    if calc_forces:
        grads = jax.grad(lambda p, bv: jnp.sum(energy_fn(p, bv)),
                         argnums=(0, 1))(pos, bond_vec)
        forces = -grads[0]                                             # (N, 3)
        if calc_hessian:
            # hessian[i] = d(forces_flat[i]) / d(pos)  (matches the PyTorch loop)
            def force_flat(p):
                return (-jax.grad(
                    lambda pp: jnp.sum(energy_fn(pp, bond_vec)))(p)).reshape(-1)
            s = pos.size
            hessian = jax.jacrev(force_flat)(pos).reshape(s, s)

    if calc_stresses:
        f_ij = -grads[1]                                               # (E, 3)
        E = bond_vec.shape[0]

        # Per-graph edge counts / offsets (variable-size graphs supported).
        counts = jnp.zeros((G,), jnp.int32).at[edge_graph_ids].add(1)
        offsets = jnp.concatenate(
            [jnp.zeros((1,), jnp.int32), jnp.cumsum(counts)[:-1].astype(jnp.int32)])
        within = jnp.arange(E, dtype=jnp.int32) - offsets[edge_graph_ids]

        # Static padded sizes: edge axis padded once to a multiple of 128 so the
        # lane axis is dense; no padding of the cartesian axis.
        max_edges = int(jax.device_get(jnp.max(counts)))
        E_pad = max(LANE, ((max_edges + LANE - 1) // LANE) * LANE)

        # Graphs per grid step: amortize ~0.35us/step overhead, stay well under
        # the VMEM budget (2 inputs x 2 pipeline buffers), safe for v7x's 64 MiB.
        per_graph_bytes = 2 * 2 * 3 * E_pad * 4
        vmem_budget = 8 * 1024 * 1024
        B_g = int(max(1, min(G, vmem_budget // per_graph_bytes)))
        G_pad = ((G + B_g - 1) // B_g) * B_g
        # TODO(synk): if a single graph's tile exceeds the VMEM budget, add an
        # edge-tiling grid axis with a VMEM accumulator (pl.when init/finalize).

        bv_packed = _pack_edges(bond_vec, edge_graph_ids, within, G_pad, E_pad)
        fij_packed = _pack_edges(f_ij, edge_graph_ids, within, G_pad, E_pad)

        scale = jnp.zeros((G_pad,), jnp.float32).at[:G].set(
            -EV_A3_TO_GPA / vol_per_graph.astype(jnp.float32)
        ).reshape(G_pad, 1, 1)

        stress33 = compute_stresses(bv_packed, fij_packed, scale, B_g)[:G]  # (G,3,3)
        stresses = stress33.reshape(3 * G, 3)   # == torch.cat of per-graph 3x3

    return total_energies, forces, stresses, hessian


# --------------------------------------------------------------------------
if __name__ == "__main__":
    key = jax.random.PRNGKey(0)
    nodes_per_graph = [4, 5]         # variable-size batched graphs (DGL-style)
    G = len(nodes_per_graph)
    N = sum(nodes_per_graph)
    n_elem = 8
    H = 16

    k1, k2, k3, k4, k5, k6 = jax.random.split(key, 6)
    pos = jax.random.normal(k1, (N, 3), jnp.float32)
    z = jax.random.randint(k2, (N,), 0, n_elem)
    element_refs = jax.random.normal(k3, (n_elem,), jnp.float32)

    model_params = {
        "w1": 0.3 * jax.random.normal(k4, (3, H), jnp.float32),
        "b1": jnp.zeros((H,), jnp.float32),
        "w2": 0.3 * jax.random.normal(k5, (H, 1), jnp.float32),
        "species_w": jax.random.normal(k6, (n_elem,), jnp.float32),
    }

    # edges: all ordered pairs (i != j) within each graph, contiguous per graph
    src_l, dst_l, eg_l, ng_l = [], [], [], []
    base = 0
    for g, npg in enumerate(nodes_per_graph):
        ng_l += [g] * npg
        for i in range(npg):
            for j in range(npg):
                if i != j:
                    src_l.append(base + i)
                    dst_l.append(base + j)
                    eg_l.append(g)
        base += npg
    src = jnp.array(src_l, jnp.int32)
    dst = jnp.array(dst_l, jnp.int32)
    edge_graph_ids = jnp.array(eg_l, jnp.int32)
    node_graph_ids = jnp.array(ng_l, jnp.int32)

    bond_vec = pos[dst] - pos[src]                        # (E, 3), independent leaf
    vol_per_graph = jnp.array([10.0, 12.5], jnp.float32)  # g.ndata['volume'][first node]

    total_energies, forces, stresses, hessian = potential_forward(
        model_params, element_refs, pos, bond_vec, z,
        node_graph_ids, edge_graph_ids, vol_per_graph, G,
        calc_forces=True, calc_stresses=True, calc_hessian=False)

    jax.block_until_ready((total_energies, forces, stresses, hessian))

    # Plain-JAX reference for the Pallas stress kernel (variable edge counts).
    grads_ref = jax.grad(
        lambda p, bv: jnp.sum(model_energy(p, bv, z, node_graph_ids,
                                           edge_graph_ids, model_params, G)),
        argnums=(0, 1))(pos, bond_vec)
    f_ij_ref = -grads_ref[1]
    blocks = []
    off = 0
    for g, npg in enumerate(nodes_per_graph):
        ne = npg * (npg - 1)
        bvg = bond_vec[off:off + ne]
        fg = f_ij_ref[off:off + ne]
        blocks.append(-EV_A3_TO_GPA * (bvg.T @ fg) / vol_per_graph[g])
        off += ne
    ref_stresses = jnp.concatenate(blocks, axis=0)

    assert total_energies.shape == (G,)
    assert forces.shape == (N, 3)
    assert stresses.shape == (3 * G, 3)
    assert bool(jnp.allclose(stresses, ref_stresses, rtol=2e-3, atol=2e-3)), \
        "Pallas stress kernel mismatch vs reference"
    print("KERNEL_OK")
</pallas_src>

<mosaic_0001>
module attributes {stable_mosaic.version = 11 : i64} {
  func.func @_stress_kernel(%arg0: i32, %arg1: memref<2x1x1xf32, #tpu.memory_space<vmem>>, %arg2: memref<2x3x128xf32, #tpu.memory_space<vmem>>, %arg3: memref<2x3x128xf32, #tpu.memory_space<vmem>>, %arg4: memref<2x3x3xf32, #tpu.memory_space<vmem>>) attributes {dimension_semantics = [#tpu.dimension_semantics<parallel>], iteration_bounds = array<i64: 1>, scalar_prefetch = 0 : i64, scratch_operands = 0 : i64, tpu.core_type = #tpu.core_type<tc>, window_params = [{transform_indices = @transform_0, window_bounds = array<i64: 2, 1, 1>}, {transform_indices = @transform_1, window_bounds = array<i64: 2, 3, 128>}, {transform_indices = @transform_2, window_bounds = array<i64: 2, 3, 128>}, {transform_indices = @transform_3, window_bounds = array<i64: 2, 3, 3>}]} {
    %c0 = arith.constant 0 : index
    %c0_0 = arith.constant 0 : index
    %c0_1 = arith.constant 0 : index
    %0 = vector.load %arg2[%c0, %c0_0, %c0_1] : memref<2x3x128xf32, #tpu.memory_space<vmem>>, vector<2x3x128xf32>
    %c0_2 = arith.constant 0 : index
    %c0_3 = arith.constant 0 : index
    %c0_4 = arith.constant 0 : index
    %1 = vector.load %arg3[%c0_2, %c0_3, %c0_4] : memref<2x3x128xf32, #tpu.memory_space<vmem>>, vector<2x3x128xf32>
    %2 = vector.extract_strided_slice %1 {offsets = [0, 0, 0], sizes = [2, 1, 128], strides = [1, 1, 1]} : vector<2x3x128xf32> to vector<2x1x128xf32>
    %3 = vector.broadcast %2 : vector<2x1x128xf32> to vector<2x3x128xf32>
    %4 = arith.mulf %0, %3 : vector<2x3x128xf32>
    %cst = arith.constant dense<0.000000e+00> : vector<2x3xf32>
    %5 = vector.multi_reduction <add>, %4, %cst [2] : vector<2x3x128xf32> to vector<2x3xf32>
    %6 = vector.shape_cast %5 : vector<2x3xf32> to vector<2x3x1xf32>
    %7 = vector.extract_strided_slice %1 {offsets = [0, 1, 0], sizes = [2, 1, 128], strides = [1, 1, 1]} : vector<2x3x128xf32> to vector<2x1x128xf32>
    %8 = vector.broadcast %7 : vector<2x1x128xf32> to vector<2x3x128xf32>
    %9 = arith.mulf %0, %8 : vector<2x3x128xf32>
    %cst_5 = arith.constant dense<0.000000e+00> : vector<2x3xf32>
    %10 = vector.multi_reduction <add>, %9, %cst_5 [2] : vector<2x3x128xf32> to vector<2x3xf32>
    %11 = vector.shape_cast %10 : vector<2x3xf32> to vector<2x3x1xf32>
    %12 = vector.extract_strided_slice %1 {offsets = [0, 2, 0], sizes = [2, 1, 128], strides = [1, 1, 1]} : vector<2x3x128xf32> to vector<2x1x128xf32>
    %13 = vector.broadcast %12 : vector<2x1x128xf32> to vector<2x3x128xf32>
    %14 = arith.mulf %0, %13 : vector<2x3x128xf32>
    %cst_6 = arith.constant dense<0.000000e+00> : vector<2x3xf32>
    %15 = vector.multi_reduction <add>, %14, %cst_6 [2] : vector<2x3x128xf32> to vector<2x3xf32>
    %16 = vector.shape_cast %15 : vector<2x3xf32> to vector<2x3x1xf32>
    %17 = tpu.concatenate %6, %11, %16 in 2 : vector<2x3x1xf32>, vector<2x3x1xf32>, vector<2x3x1xf32> -> vector<2x3x3xf32>
    %c0_7 = arith.constant 0 : index
    %c0_8 = arith.constant 0 : index
    %c0_9 = arith.constant 0 : index
    %18 = vector.load %arg1[%c0_7, %c0_8, %c0_9] : memref<2x1x1xf32, #tpu.memory_space<vmem>>, vector<2x1x1xf32>
    %19 = vector.broadcast %18 : vector<2x1x1xf32> to vector<2x3x3xf32>
    %20 = arith.mulf %17, %19 : vector<2x3x3xf32>
    %c0_10 = arith.constant 0 : index
    %c0_11 = arith.constant 0 : index
    %c0_12 = arith.constant 0 : index
    %21 = vector.load %arg4[%c0_10, %c0_11, %c0_12] : memref<2x3x3xf32, #tpu.memory_space<vmem>>, vector<2x3x3xf32>
    tpu.vector_store %arg4[%c0_10, %c0_11, %c0_12], %20 {strides = array<i32>} : memref<2x3x3xf32, #tpu.memory_space<vmem>>, vector<2x3x3xf32>,
    return
  }
  func.func @transform_0(%arg0: i32) -> (i32, i32, i32) {
    %c0_i32 = arith.constant 0 : i32
    %c0_i32_0 = arith.constant 0 : i32
    %c0_i32_1 = arith.constant 0 : i32
    return %arg0, %c0_i32, %c0_i32_0 : i32, i32, i32
  }
  func.func @transform_1(%arg0: i32) -> (i32, i32, i32) {
    %c0_i32 = arith.constant 0 : i32
    %c0_i32_0 = arith.constant 0 : i32
    %c0_i32_1 = arith.constant 0 : i32
    return %arg0, %c0_i32, %c0_i32_0 : i32, i32, i32
  }
  func.func @transform_2(%arg0: i32) -> (i32, i32, i32) {
    %c0_i32 = arith.constant 0 : i32
    %c0_i32_0 = arith.constant 0 : i32
    %c0_i32_1 = arith.constant 0 : i32
    return %arg0, %c0_i32, %c0_i32_0 : i32, i32, i32
  }
  func.func @transform_3(%arg0: i32) -> (i32, i32, i32) {
    %c0_i32 = arith.constant 0 : i32
    %c0_i32_0 = arith.constant 0 : i32
    %c0_i32_1 = arith.constant 0 : i32
    return %arg0, %c0_i32, %c0_i32_0 : i32, i32, i32
  }
}

</mosaic_0001>

<bundles_post_ra>
// kernel: tpu_custom_call.1
= control target key start
LH: loop header
LB: loop body
LE: loop exit
PB: predicated region body
PF: predicated region fallthrough
CT: control target
= control target key end

     0   :  { %v18_v0 = vlaneseq  ;;  %v107_v1 = vmov 0   ;;  %vm28_vm0 = vcmask 1042432   ;;  %vm70_vm1 = vcmask 15360   ;;  %s158_s2 = inlined_call_operand.vmem [shape: f32[2,3,128], index: 2, kind: input, shape index: {}]   ;;  %s159_s1 = inlined_call_operand.vmem [shape: f32[2,3,128], index: 1, kind: input, shape index: {}]   ;;  %s160_s0 = inlined_call_operand.vmem [shape: f32[2,1,1], index: 0, kind: input, shape index: {}]   ;;  %s161_s3 = inlined_call_operand.vmem [shape: f32[2,3,3], index: 3, kind: output, shape index: {}]  }
   0x1   :  { %106 = vset.pattern.permute.xlu1 %v107_v1  ;;  %105 = vset.pattern.permute.xlu0 %v107_v1  ;;  %v16_v3 = vld [vmem:[%s158_s2] sm:$0x7]  ;;  %v17_v4 = vld [vmem:[%s158_s2 + $0x4] sm:$0x7]  ;;  %vm67_vm2 = vcmask 7168   ;;  %vm95_vm3 = vcmask 18432  }
   0x2   :  { %v19_v2 = vshrl.u32 %v18_v0, 7  ;;  %v14_v8 = vld [vmem:[%s159_s1] sm:$0x7]  ;;  %v15_v9 = vld [vmem:[%s159_s1 + $0x4] sm:$0x7] }
   0x3   :  { %v103_v28 = vld [vmem:[%s160_s0 + $0x1] ss:$0 sm:$0xff]  ;;  %v102_v29 = vld [vmem:[%s160_s0] ss:$0 sm:$0xff] }
   0x4   :  { %v37_v5 = vsub.s32 1, %v19_v2  ;;  %v20_v6 = vsub.s32 0, %v19_v2  ;;  %v53_v7 = vsub.s32 2, %v19_v2 }
   0x6   :  { %v38_v10 = vrot.slane %v16_v3, %v37_v5  ;;  %v21_v11 = vrot.slane %v16_v3, %v20_v6  ;;  %v42_v12 = vrot.slane %v17_v4, %v37_v5  ;;  %v25_v13 = vrot.slane %v17_v4, %v20_v6 }
   0x7   :  { %v58_v14 = vrot.slane %v17_v4, %v53_v7  ;;  %v54_v15 = vrot.slane %v16_v3, %v53_v7 }
   0x8   :  { %v43_v16 = vmul.f32 %v38_v10, %v14_v8  ;;  %v26_v17 = vmul.f32 %v21_v11, %v14_v8  ;;  %v44_v18 = vmul.f32 %v42_v12, %v15_v9  ;;  %v27_v19 = vmul.f32 %v25_v13, %v15_v9 }
   0x9   :  { %v60_v24 = vmul.f32 %v58_v14, %v15_v9  ;;  %v59_v25 = vmul.f32 %v54_v15, %v14_v8 }
   0xa   :  { %v45_v20 = vsel %vm28_vm0, %v43_v16, 0.0  ;;  %v29_v21 = vsel %vm28_vm0, %v26_v17, 0.0  ;;  %v48_v22 = vsel %vm28_vm0, %v44_v18, 0.0  ;;  %v32_v23 = vsel %vm28_vm0, %v27_v19, 0.0 }
   0xb   :  { %46 = vadd.xlane.f32.xlu1 %v45_v20  ;;  %30 = vadd.xlane.f32.xlu0 %v29_v21  ;;  %v64_v26 = vsel %vm28_vm0, %v60_v24, 0.0  ;;  %v61_v27 = vsel %vm28_vm0, %v59_v25, 0.0 }
   0xf   :  { %49 = vadd.xlane.f32.xlu1 %v48_v22  ;;  %33 = vadd.xlane.f32.xlu0 %v32_v23 }
  0x13   :  { %65 = vadd.xlane.f32.xlu1 %v64_v26  ;;  %62 = vadd.xlane.f32.xlu0 %v61_v27 }
  0x24   :  { %90 = vperm.xlu1 %106, %v103_v28  }
  0x29   :  { %86 = vperm.xlu0 %105, %v102_v29  }
  0x98   :  { %v47_v30 = vpop.xlane.xlu1 %46  ;;  %v31_v31 = vpop.xlane.xlu0 %30 }
  0x99   :  { %v68_v40 = vsel %vm67_vm2, %v31_v31, %v47_v30 }
  0x9c   :  { %v50_v32 = vpop.xlane.xlu1 %49  ;;  %v34_v33 = vpop.xlane.xlu0 %33 }
  0x9d   :  { %v69_v35 = vsel %vm67_vm2, %v34_v33, %v50_v32 }
  0xa0   :  { %v66_v34 = vpop.xlane.xlu1 %65  ;;  %v63_v36 = vpop.xlane.xlu0 %62 }
  0xa1   :  { %v72_v37 = vsel %vm70_vm1, %v69_v35, %v66_v34  ;;  %v71_v41 = vsel %vm70_vm1, %v68_v40, %v63_v36 }
  0xa4   :  { %v91_v38 = vpop.permute.xlu1 %90 }
  0xa5   :  { %v94_v39 = vmul.f32 %v91_v38, %v72_v37 }
  0xa7   :  { %97 = vst.msk [vmem:[%s161_s3 + $0x4] sm:$0x7] %vm95_vm3, %v94_v39 }
  0xa8   :  { %v87_v42 = vpop.permute.xlu0 %86 }
  0xa9   :  { %v93_v43 = vmul.f32 %v87_v42, %v71_v41 }
  0xab   :  { %96 = vst.msk [vmem:[%s161_s3] sm:$0x7] %vm95_vm3, %v93_v43 }

</bundles_post_ra>
